<compile_context>
chip_gen: v6e
topology: v6e:2x2x1
jax: 0.10.0
libtpu: 0.0.40
codegen_flags: <defaults>
</compile_context>

<pallas_src>
import jax
import jax.numpy as jnp
from jax.experimental import pallas as pl
from jax.experimental.pallas import tpu as pltpu


# -----------------------------------------------------------------------------
# Kernels (x tile, resident weight, resident bias, out)
# -----------------------------------------------------------------------------
def _sigmoid_head_kernel(x_ref, w_ref, b_ref, o_ref):
    # Works for both the packed (TBp, 128)@(128, 4*2) and unpacked (TB, D)@(D, 2)
    # layouts: softmax over 2 logits == sigmoid of the pairwise logit
    # differences, and the duplicated/negated weight columns already emit
    # [p0, p1] (per packed segment) in the correct interleaved order, so the
    # epilogue is purely elementwise (EUP exp, no cross-lane reductions).
    z = jnp.dot(x_ref[...], w_ref[...],
                preferred_element_type=jnp.float32) + b_ref[...]
    o_ref[...] = (1.0 / (1.0 + jnp.exp(-z))).astype(o_ref.dtype)


def _softmax_head_kernel(x_ref, w_ref, b_ref, o_ref):
    # General C: fused linear + numerically-stable softmax along the class axis.
    logits = jnp.dot(x_ref[...], w_ref[...],
                     preferred_element_type=jnp.float32) + b_ref[...]
    m = jnp.max(logits, axis=-1, keepdims=True)
    e = jnp.exp(logits - m)
    s = jnp.sum(e, axis=-1, keepdims=True)
    r = pl.reciprocal(s, approx=True)   # EUP slot (otherwise idle)
    r = r * (2.0 - s * r)               # one Newton step -> ~f32 accuracy
    o_ref[...] = (e * r).astype(o_ref.dtype)


# -----------------------------------------------------------------------------
# Wrapper
# -----------------------------------------------------------------------------
def _pick_tile_rows(total_rows, desired_rows):
    if desired_rows >= total_rows:
        return total_rows                    # full extent: no (8, .) constraint
    return max(8, (desired_rows // 8) * 8)   # otherwise sublane multiple of 8


def label_classifier0(features, weight_t, bias, *, block_b=16384,
                      use_two_class_fastpath=True):
    """features: (B, D) f32, weight_t: (D, C) f32 (transposed torch weight),
    bias: (C,) f32  ->  softmax probabilities (B, C) f32."""
    B, D = features.shape
    C = weight_t.shape[1]
    two_class = use_two_class_fastpath and C == 2

    if two_class:
        kernel = _sigmoid_head_kernel
        wd = weight_t[:, 0:1] - weight_t[:, 1:2]            # (D, 1)
        w_in = jnp.concatenate([wd, -wd], axis=1)            # (D, 2)
        bd = (bias[0] - bias[1]).reshape(1, 1)
        b_in = jnp.concatenate([bd, -bd], axis=1)             # (1, 2)
    else:
        kernel = _softmax_head_kernel
        w_in = weight_t                                       # (D, C)
        b_in = bias.reshape(1, C)                             # (1, C)

    # Lane-dense row packing: only the elementwise two-class epilogue supports
    # it (the general softmax would need per-segment reductions).
    pack = 1
    if two_class and D <= 128 and 128 % D == 0:
        p = 128 // D
        if p > 1 and B % p == 0:   # avoid a jnp.pad full-input copy for ragged B
            pack = p

    if pack > 1:
        x_in = features.reshape(B // pack, pack * D)   # free row-major bitcast
        eye = jnp.eye(pack, dtype=w_in.dtype)
        # W_big[p*D + d, q*C + c] = W[d, c] * delta_pq   (block-diagonal)
        w_in = jnp.einsum('pq,dc->pdqc', eye, w_in).reshape(pack * D, pack * C)
        b_in = jnp.tile(b_in, (1, pack))                # (1, pack*C)
        desired = block_b // pack
    else:
        x_in = features
        # Unpacked tiles are lane-padded to 128 in VMEM; cap rows so the
        # double-buffered x/out tiles stay well under every scoped-VMEM default.
        desired = min(block_b, 4096)

    rows, kdim = x_in.shape
    ncols = w_in.shape[1]
    tb = _pick_tile_rows(rows, max(8, desired))
    grid = (pl.cdiv(rows, tb),)   # ragged edge block handled by Pallas masking

    out = pl.pallas_call(
        kernel,
        out_shape=jax.ShapeDtypeStruct((rows, ncols), jnp.float32),
        grid=grid,
        in_specs=[
            pl.BlockSpec((tb, kdim), lambda i: (i, 0)),      # streamed x tile
            pl.BlockSpec((kdim, ncols), lambda i: (0, 0)),   # resident weight
            pl.BlockSpec((1, ncols), lambda i: (0, 0)),      # resident bias
        ],
        out_specs=pl.BlockSpec((tb, ncols), lambda i: (i, 0)),
        # TODO(synk): on v7x, plain "parallel" may not shard the grid across the
        # 2 TensorCores; switch to pltpu.CORE_PARALLEL and verify in a trace.
        compiler_params=pltpu.CompilerParams(
            dimension_semantics=("parallel",)),
    )(x_in, w_in, b_in)

    if pack > 1:
        out = out.reshape(B, C)   # free bitcast back to (B, C)
    return out


def _reference(features, weight_t, bias):
    logits = features @ weight_t + bias
    return jax.nn.softmax(logits, axis=-1)


if __name__ == "__main__":
    # opt.latent_dim = 32, opt.n_classes = 2  (softmax dim = n_classes - 1 = 1)
    B, D, C = 8, 32, 2

    key = jax.random.PRNGKey(0)
    kx, kw, kb = jax.random.split(key, 3)

    features = jax.random.normal(kx, (B, D), dtype=jnp.float32)

    # Deterministic init mirroring nn.Linear's uniform(-1/sqrt(D), 1/sqrt(D)).
    bound = 1.0 / jnp.sqrt(jnp.float32(D))
    # PyTorch weight is (C, D); stored transposed as (D, C) for the MXU.
    weight_t = jax.random.uniform(kw, (D, C), dtype=jnp.float32,
                                  minval=-bound, maxval=bound)
    bias = jax.random.uniform(kb, (C,), dtype=jnp.float32,
                              minval=-bound, maxval=bound)

    out = jax.block_until_ready(label_classifier0(features, weight_t, bias))
    ref = _reference(features, weight_t, bias)
    assert out.shape == (B, C)
    assert jnp.allclose(out, ref, atol=1e-5, rtol=1e-5)
    assert jnp.allclose(jnp.sum(out, axis=-1), jnp.ones((B,)), atol=1e-5)

    # Multi-step tiled path with a ragged edge block (no pad / slice copies):
    # packed two-class fast path and the general softmax kernel.
    B2 = 300
    features2 = jax.random.normal(jax.random.PRNGKey(1), (B2, D),
                                  dtype=jnp.float32)
    ref2 = _reference(features2, weight_t, bias)
    out_fast = jax.block_until_ready(
        label_classifier0(features2, weight_t, bias, block_b=128))
    out_gen = jax.block_until_ready(
        label_classifier0(features2, weight_t, bias, block_b=128,
                          use_two_class_fastpath=False))
    assert out_fast.shape == (B2, C) and out_gen.shape == (B2, C)
    assert jnp.allclose(out_fast, ref2, atol=1e-5, rtol=1e-5)
    assert jnp.allclose(out_gen, ref2, atol=1e-5, rtol=1e-5)

    # Batch not divisible by the packing factor -> unpacked two-class fallback.
    B3 = 10
    features3 = jax.random.normal(jax.random.PRNGKey(2), (B3, D),
                                  dtype=jnp.float32)
    out3 = jax.block_until_ready(label_classifier0(features3, weight_t, bias))
    assert jnp.allclose(out3, _reference(features3, weight_t, bias),
                        atol=1e-5, rtol=1e-5)

    print("KERNEL_OK")
</pallas_src>

<mosaic_0001>
module attributes {stable_mosaic.version = 11 : i64} {
  func.func @_sigmoid_head_kernel(%arg0: i32, %arg1: memref<2x128xf32, #tpu.memory_space<vmem>>, %arg2: memref<128x8xf32, #tpu.memory_space<vmem>>, %arg3: memref<1x8xf32, #tpu.memory_space<vmem>>, %arg4: memref<2x8xf32, #tpu.memory_space<vmem>>) attributes {dimension_semantics = [#tpu.dimension_semantics<parallel>], iteration_bounds = array<i64: 1>, scalar_prefetch = 0 : i64, scratch_operands = 0 : i64, tpu.core_type = #tpu.core_type<tc>, window_params = [{transform_indices = @transform_0, window_bounds = array<i64: 2, 128>}, {pipeline_mode = #tpu.pipeline_mode<synchronous>, transform_indices = @transform_1, window_bounds = array<i64: 128, 8>}, {pipeline_mode = #tpu.pipeline_mode<synchronous>, transform_indices = @transform_2, window_bounds = array<i64: 1, 8>}, {transform_indices = @transform_3, window_bounds = array<i64: 2, 8>}]} {
    %c0 = arith.constant 0 : index
    %c0_0 = arith.constant 0 : index
    %0 = vector.load %arg1[%c0, %c0_0] : memref<2x128xf32, #tpu.memory_space<vmem>>, vector<2x128xf32>
    %c0_1 = arith.constant 0 : index
    %c0_2 = arith.constant 0 : index
    %1 = vector.load %arg2[%c0_1, %c0_2] : memref<128x8xf32, #tpu.memory_space<vmem>>, vector<128x8xf32>
    %cst = arith.constant dense<0.000000e+00> : vector<2x8xf32>
    %2 = tpu.matmul %0, %1, %cst {dimension_numbers = #tpu.dot_dimension_numbers<[1], [0], [0], [1], [0, 0, 1, 1], [], []>} : vector<2x128xf32>, vector<128x8xf32>, vector<2x8xf32> -> vector<2x8xf32>
    %c0_3 = arith.constant 0 : index
    %c0_4 = arith.constant 0 : index
    %3 = vector.load %arg3[%c0_3, %c0_4] : memref<1x8xf32, #tpu.memory_space<vmem>>, vector<1x8xf32>
    %4 = vector.broadcast %3 : vector<1x8xf32> to vector<2x8xf32>
    %5 = arith.addf %2, %4 : vector<2x8xf32>
    %cst_5 = arith.constant 0.000000e+00 : f32
    %6 = vector.broadcast %cst_5 : f32 to vector<2x8xf32>
    %7 = arith.subf %6, %5 : vector<2x8xf32>
    %8 = math.exp %7 : vector<2x8xf32>
    %cst_6 = arith.constant 1.000000e+00 : f32
    %9 = vector.broadcast %cst_6 : f32 to vector<2x8xf32>
    %10 = arith.addf %9, %8 : vector<2x8xf32>
    %cst_7 = arith.constant 1.000000e+00 : f32
    %11 = vector.broadcast %cst_7 : f32 to vector<2x8xf32>
    %12 = arith.divf %11, %10 : vector<2x8xf32>
    %c0_8 = arith.constant 0 : index
    %c0_9 = arith.constant 0 : index
    %13 = vector.load %arg4[%c0_8, %c0_9] : memref<2x8xf32, #tpu.memory_space<vmem>>, vector<2x8xf32>
    tpu.vector_store %arg4[%c0_8, %c0_9], %12 {strides = array<i32>} : memref<2x8xf32, #tpu.memory_space<vmem>>, vector<2x8xf32>,
    return
  }
  func.func @transform_0(%arg0: i32) -> (i32, i32) {
    %c0_i32 = arith.constant 0 : i32
    %c0_i32_0 = arith.constant 0 : i32
    return %arg0, %c0_i32 : i32, i32
  }
  func.func @transform_1(%arg0: i32) -> (i32, i32) {
    %c0_i32 = arith.constant 0 : i32
    %c0_i32_0 = arith.constant 0 : i32
    %c0_i32_1 = arith.constant 0 : i32
    return %c0_i32, %c0_i32_0 : i32, i32
  }
  func.func @transform_2(%arg0: i32) -> (i32, i32) {
    %c0_i32 = arith.constant 0 : i32
    %c0_i32_0 = arith.constant 0 : i32
    %c0_i32_1 = arith.constant 0 : i32
    return %c0_i32, %c0_i32_0 : i32, i32
  }
  func.func @transform_3(%arg0: i32) -> (i32, i32) {
    %c0_i32 = arith.constant 0 : i32
    %c0_i32_0 = arith.constant 0 : i32
    return %arg0, %c0_i32 : i32, i32
  }
}

</mosaic_0001>

<bundles_post_ra>
// kernel: tpu_custom_call.1
= control target key start
LH: loop header
LB: loop body
LE: loop exit
PB: predicated region body
PF: predicated region fallthrough
CT: control target
= control target key end

     0   :  { %v213_v1 = vmov 0.0   ;;  %vm214_vm0 = vmmov 0   ;;  %s293_s0 = inlined_call_operand.vmem [shape: f32[2,128], index: 0, kind: input, shape index: {}]   ;;  %s294_s1 = inlined_call_operand.vmem [shape: f32[128,8], index: 1, kind: input, shape index: {}]   ;;  %s295_s2 = inlined_call_operand.vmem [shape: f32[1,8], index: 2, kind: input, shape index: {}]   ;;  %s296_s3 = inlined_call_operand.hbm [shape: f32[2,8], index: 3, kind: output, shape index: {}]  }
   0x1   :  { %v31_v0 = vld [vmem:[%s294_s1 + $0x78] sm:$0xff]  ;;  %149 = vmatprep.subr.mxu0 %v213_v1  ;;  %v30_v2 = vld [vmem:[%s294_s1 + $0x70] sm:$0xff]  ;;  %181 = vmatprep.mubr.msk.f32.mxu0 %vm214_vm0, %v213_v1  ;;  %v29_v3 = vld [vmem:[%s294_s1 + $0x68] sm:$0xff] }
   0x2   :  { %150 = vmatpush3.msra.mxu0 %v31_v0  ;;  %v28_v4 = vld [vmem:[%s294_s1 + $0x60] sm:$0xff] }
   0x3   :  { %151 = vmatprep.subr.mxu0 %v213_v1 }
   0x4   :  { %152 = vmatpush3.msra.mxu0 %v30_v2 }
   0x5   :  { %153 = vmatprep.subr.mxu0 %v213_v1 }
   0x6   :  { %154 = vmatpush3.msra.mxu0 %v29_v3 }
   0x7   :  { %8 = vsyncpa [#allocation3], 0  ;;  %155 = vmatprep.subr.mxu0 %v213_v1  ;;  %v27_v5 = vld [vmem:[%s294_s1 + $0x58] sm:$0xff]  ;;  %v26_v6 = vld [vmem:[%s294_s1 + $0x50] sm:$0xff]  ;;  %vm115_vm1 = vcmask 58368  }
   0x8   :  { %156 = vmatpush3.msra.mxu0 %v28_v4  ;;  %v25_v7 = vld [vmem:[%s294_s1 + $0x48] sm:$0xff]  ;;  %v24_v8 = vld [vmem:[%s294_s1 + $0x40] sm:$0xff]  ;;  %v23_v9 = vld [vmem:[%s294_s1 + $0x38] sm:$0xff] }
   0x9   :  { %157 = vmatprep.subr.mxu0 %v213_v1  ;;  %v22_v10 = vld [vmem:[%s294_s1 + $0x30] sm:$0xff]  ;;  %v21_v11 = vld [vmem:[%s294_s1 + $0x28] sm:$0xff]  ;;  %v20_v12 = vld [vmem:[%s294_s1 + $0x20] sm:$0xff] }
   0xa   :  { %158 = vmatpush3.msra.mxu0 %v27_v5  ;;  %v19_v13 = vld [vmem:[%s294_s1 + $0x18] sm:$0xff]  ;;  %v18_v14 = vld [vmem:[%s294_s1 + $0x10] sm:$0xff]  ;;  %v17_v15 = vld [vmem:[%s294_s1 + $0x8] sm:$0xff] }
   0xb   :  { %159 = vmatprep.subr.mxu0 %v213_v1  ;;  %v16_v16 = vld [vmem:[%s294_s1] sm:$0xff]  ;;  %s215_s1 = smov [#allocation2]  }
   0xc   :  { %160 = vmatpush3.msra.mxu0 %v26_v6  ;;  %v15_v17 = vld [vmem:[%s293_s0] sm:$0x3]  ;;  %s123_s21 = sshll.u32 %s215_s1, 4  ;;  %s124_s21 = int_to_ptr.vmem [resolvable:$true] %s123_s21 }
   0xd   :  { %161 = vmatprep.subr.mxu0 %v213_v1  ;;  %v131_v18 = vld [vmem:[%s295_s2] ss:$0 sm:$0xff]  ;;  %s191_s0 = scalar_lea.vmem %s124_s21, 32  ;;  %p196_p1 = scmp.lt.s32.totalorder %s124_s21, %s124_s21 }
   0xe   :  { %162 = vmatpush3.msra.mxu0 %v25_v7  ;;  %p192_p0 = scmp.ne.s32.totalorder %s124_s21, %s191_s0  ;;  %p197_p2 = scmp.lt.s32.totalorder %s191_s0, %s191_s0 }
   0xf   :  { %163 = vmatprep.subr.mxu0 %v213_v1 }
  0x10   :  { %164 = vmatpush3.msra.mxu0 %v24_v8  ;;  %p198_p3 = por %p197_p2, %p196_p1 }
  0x11   :  { %165 = vmatprep.subr.mxu0 %v213_v1 }
  0x12   :  { %166 = vmatpush3.msra.mxu0 %v23_v9  ;;  %p199_p4 = pnand %p198_p3, %p192_p0 }
  0x13   :  { %167 = vmatprep.subr.mxu0 %v213_v1 }
  0x14   :  { %168 = vmatpush3.msra.mxu0 %v22_v10 }
  0x15   :  { %169 = vmatprep.subr.mxu0 %v213_v1 }
  0x16   :  { %170 = vmatpush3.msra.mxu0 %v21_v11 }
  0x17   :  { %171 = vmatprep.subr.mxu0 %v213_v1 }
  0x18   :  { %172 = vmatpush3.msra.mxu0 %v20_v12 }
  0x19   :  { %173 = vmatprep.subr.mxu0 %v213_v1 }
  0x1a   :  { %174 = vmatpush3.msra.mxu0 %v19_v13 }
  0x1b   :  { %175 = vmatprep.subr.mxu0 %v213_v1 }
  0x1c   :  { %176 = vmatpush3.msra.mxu0 %v18_v14 }
  0x1d   :  { %177 = vmatprep.subr.mxu0 %v213_v1 }
  0x1e   :  { %178 = vmatpush3.msra.mxu0 %v17_v15 }
  0x1f   :  { %179 = vmatprep.subr.mxu0 %v213_v1 }
  0x20   :  { %180 = vmatpush3.msra.mxu0 %v16_v16 }
  0x21   :  { %182 = vmatmul.mubr.f32.vlgmr.msra.gmra.mxu0 %v15_v17 }
  0xe1   :  { %v105_v19 = vpop.f32.mrf.mxu0 }
  0xe2   :  { %v106_v20 = vadd.f32 %v131_v18, %v105_v19 }
  0xe3   :  { %v183_v21 = vpop.f32.mrf.mxu0 }
  0xe4   :  { %v109_v22 = vsub.f32 0.0, %v106_v20 }
  0xe6   :  { %v110_v23 = vmul.f32 1.442695, %v109_v22 }
  0xe8   :  { %187 = vpow2.f32 %v110_v23 }
  0xf5   :  { %v188_v24 = vpop.eup %187 }
  0xf6   :  { %v112_v25 = vadd.f32 1.0, %v188_v24 }
  0xf8   :  { %189 = vrcp.f32 %v112_v25 }
 0x105   :  { %v190_v26 = vpop.eup %189 }
 0x106   :  { %116 = vst.msk [vmem:[#allocation2] sm:$0x3] %vm115_vm1, %v190_v26 }
 0x107   :  { %202 = shalt.err (!%p199_p4)
}
 0x108   :  { %126 = dma.vmem_to_hbm [thread:$0]  %s124_s21, 32, %s296_s3, [#allocation3]  }
 0x109   :  { %211 = dma.done.wait [#allocation3], 32  }
 0x10a   :  { %212 = vsyncadd [#allocation3], 4294967264 }
 0x10b   :  { %130 = vsyncpa [#allocation3], 1 }

</bundles_post_ra>
